<compile_context>
chip_gen: v7x
topology: tpu7x:2x2x1
jax: 0.10.0
libtpu: 0.0.40
codegen_flags: <defaults>
</compile_context>

<pallas_src>
import functools
import numpy as np

import jax
import jax.numpy as jnp
from jax.experimental import pallas as pl
from jax.experimental.pallas import tpu as pltpu


_BN_EPS = 1e-5
_TM_MAX = 512          # target GEMM rows per tile for the shifted 3x3 conv
_TM_MAX_GEMM = 1024    # target rows per tile for the plain GEMM / 1x1 kernels


def _cdiv(a, b):
    return -(-a // b)


def _round_up(x, m):
    return _cdiv(x, m) * m


def _vmem_capacity_bytes():
    try:
        info = pltpu.get_tpu_info()
        return int(getattr(info, "vmem_capacity_bytes", 64 * 1024 * 1024))
    except Exception:
        return 64 * 1024 * 1024


_VMEM_CAP = _vmem_capacity_bytes()
# v5e / v6e: 128 MiB VMEM per core -> wide Cout tiles; v7x: 64 MiB per TC.
_TCO_MAX = 512 if _VMEM_CAP >= 100 * 1024 * 1024 else 256
_VMEM_LIMIT = int(min(3 * _VMEM_CAP // 4, 96 * 1024 * 1024))


def _even_tile(total, target, align=16):
    """Tile size <= ~target, multiple of `align`, tiling `total` evenly."""
    num = max(1, _cdiv(total, target))
    t = _round_up(_cdiv(total, num), align)
    num = _cdiv(total, t)
    return t, num


# -----------------------------------------------------------------------------
# Pallas kernels
# -----------------------------------------------------------------------------

def _conv3x3_bn_relu_kernel(x_hbm, w_ref, scale_ref, shift_ref, o_ref,
                            xwin_ref, sem_ref, acc_ref, *, tap_offsets):
    """Fused 3x3 conv (9 shifted GEMMs) + BN(eval) affine + ReLU.

    x_hbm    : (rows_padded, Cin) bf16, full padded activation slab in HBM (ANY)
    w_ref    : (9, Cin, TCO) bf16 weights, tap-major (resident across m tiles)
    scale_ref: (1, TCO) f32   gamma / sqrt(var + eps)
    shift_ref: (1, TCO) f32   (bias - mean) * scale + beta
    o_ref    : (TM, TCO) bf16 output tile (flat "wide" layout)
    xwin_ref : (2, TM + OVER, Cin) bf16 double-buffered window scratch
    sem_ref  : DMA semaphores (2,)
    acc_ref  : (TM, TCO) f32 accumulator scratch
    """
    m = pl.program_id(1)                 # inner axis: sequential per core
    num_m = pl.num_programs(1)
    tm = o_ref.shape[0]
    win_rows = xwin_ref.shape[1]
    slot = m % 2

    def window_copy(mi, s):
        return pltpu.make_async_copy(
            x_hbm.at[pl.ds(mi * tm, win_rows)], xwin_ref.at[s], sem_ref.at[s])

    # Prime: the first m of every co block issues its own copy, so this stays
    # correct even when the (parallel) co axis is sharded across TensorCores.
    @pl.when(m == 0)
    def _():
        window_copy(0, 0).start()

    window_copy(m, slot).wait()

    @pl.when(m + 1 < num_m)
    def _():
        window_copy(m + 1, 1 - slot).start()   # hidden behind the GEMMs below

    win = xwin_ref.at[slot]

    def mm(t):
        off = tap_offsets[t]
        return jnp.dot(win[off:off + tm, :], w_ref[t],
                       preferred_element_type=jnp.float32)

    # 9 bf16 MXU GEMMs with f32 accumulation; group taps so the accumulator
    # round-trips VMEM only 3x (vs zero-init + 9x `+=`).
    acc_ref[...] = mm(0) + mm(1) + mm(2)
    acc_ref[...] += mm(3) + mm(4) + mm(5)
    acc_ref[...] += mm(6) + mm(7) + mm(8)

    y = acc_ref[...] * scale_ref[...] + shift_ref[...]       # f32 epilogue
    o_ref[...] = jnp.maximum(y, 0.0).astype(o_ref.dtype)


def _gemm_bn_relu_kernel(x_ref, w_ref, scale_ref, shift_ref, o_ref):
    """Plain fused GEMM + BN(eval) affine + ReLU (used for the cin==1 conv)."""
    y = jnp.dot(x_ref[...], w_ref[...], preferred_element_type=jnp.float32)
    y = y * scale_ref[...] + shift_ref[...]
    o_ref[...] = jnp.maximum(y, 0.0).astype(o_ref.dtype)


def _conv1x1_softmax_kernel(x_ref, w_ref, b_ref, o_ref, *, out_ch):
    """Fused 1x1 conv + channel softmax; OC padded to 128 lanes (lane-dense)."""
    logits = jnp.dot(x_ref[...], w_ref[...],
                     preferred_element_type=jnp.float32) + b_ref[...]
    lane = jax.lax.broadcasted_iota(jnp.int32, logits.shape, 1)
    mask = lane < out_ch
    lm = jnp.where(mask, logits, jnp.float32(-1e30))
    mx = jnp.max(lm, axis=-1, keepdims=True)
    e = jnp.where(mask, jnp.exp(lm - mx), 0.0)
    o_ref[...] = (e / jnp.sum(e, axis=-1, keepdims=True)).astype(o_ref.dtype)


# -----------------------------------------------------------------------------
# pallas_call wrappers
# -----------------------------------------------------------------------------

def _pad_cout(w, scale, shift, cout, cout_p):
    if cout_p == cout:
        return w, scale, shift
    pad = cout_p - cout
    w = jnp.pad(w, ((0, 0),) * (w.ndim - 1) + ((0, pad),))
    scale = jnp.pad(scale, ((0, 0), (0, pad)))
    shift = jnp.pad(shift, ((0, 0), (0, pad)))
    return w, scale, shift


def _conv3x3_small_cin(x, w, scale, shift):
    """cin < 16 path: trivial im2col (K = 9*cin) + fused GEMM/BN/ReLU kernel."""
    N, H, W, cin = x.shape
    cout = w.shape[-1]
    cout_p = _round_up(cout, 128)
    w, scale, shift = _pad_cout(w, scale, shift, cout, cout_p)

    xp = jnp.pad(x.astype(jnp.bfloat16), ((0, 0), (1, 1), (1, 1), (0, 0)))
    taps = [xp[:, dy:dy + H, dx:dx + W, :] for dy in range(3) for dx in range(3)]
    k = 9 * cin
    p_total = N * H * W
    patches = jnp.concatenate(taps, axis=-1).reshape(p_total, k)

    tm, num_m = _even_tile(p_total, _TM_MAX_GEMM)
    p_pad = num_m * tm
    patches = jnp.pad(patches, ((0, p_pad - p_total), (0, 0)))
    wk = w.reshape(k, cout_p).astype(jnp.bfloat16)

    tco = min(_TCO_MAX, cout_p)
    assert cout_p % tco == 0
    num_co = cout_p // tco

    out = pl.pallas_call(
        _gemm_bn_relu_kernel,
        out_shape=jax.ShapeDtypeStruct((p_pad, cout_p), jnp.bfloat16),
        grid_spec=pltpu.PrefetchScalarGridSpec(
            num_scalar_prefetch=0,
            grid=(num_co, num_m),
            in_specs=[
                pl.BlockSpec((tm, k), lambda co, m: (m, 0)),
                pl.BlockSpec((k, tco), lambda co, m: (0, co)),
                pl.BlockSpec((1, tco), lambda co, m: (0, co)),
                pl.BlockSpec((1, tco), lambda co, m: (0, co)),
            ],
            out_specs=pl.BlockSpec((tm, tco), lambda co, m: (m, co)),
        ),
        compiler_params=pltpu.CompilerParams(
            dimension_semantics=("parallel", "parallel"),
            vmem_limit_bytes=_VMEM_LIMIT,
        ),
    )(patches, wk, scale, shift)

    return out[:p_total, :cout].reshape(N, H, W, cout)


def conv3x3_bn_relu(x, w, scale, shift):
    """x:(N,H,W,Cin), w:(3,3,Cin,Cout), scale/shift:(1,Cout) -> (N,H,W,Cout) bf16."""
    N, H, W, cin = x.shape
    cout = w.shape[-1]

    if cin < 16:                     # first layer: K=1 GEMMs would waste the MXU
        return _conv3x3_small_cin(x, w, scale, shift)

    cout_p = _round_up(cout, 128)    # lane-dense stores for 64-channel layers
    w, scale, shift = _pad_cout(w, scale, shift, cout, cout_p)

    Hp, Wp = H + 3, W + 2            # pad: top 1 / bottom 2 / left 1 / right 1
    xp = jnp.pad(x.astype(jnp.bfloat16), ((0, 0), (1, 2), (1, 1), (0, 0)))
    m_total = N * Hp * Wp            # batch folded into the GEMM M axis

    tm, num_m = _even_tile(m_total, _TM_MAX)
    m_pad = num_m * tm
    over = _round_up(2 * Wp + 2, 16)            # >= max tap offset
    win_rows = tm + over

    xp_flat = jnp.pad(xp.reshape(m_total, cin),
                      ((0, m_pad + over - m_total), (0, 0)))

    w9 = w.reshape(9, cin, cout_p).astype(jnp.bfloat16)
    tco = min(_TCO_MAX, cout_p)
    assert cout_p % tco == 0
    num_co = cout_p // tco
    tap_offsets = tuple(dy * Wp + dx for dy in range(3) for dx in range(3))

    kernel = functools.partial(_conv3x3_bn_relu_kernel, tap_offsets=tap_offsets)

    out = pl.pallas_call(
        kernel,
        out_shape=jax.ShapeDtypeStruct((m_pad, cout_p), jnp.bfloat16),
        grid_spec=pltpu.PrefetchScalarGridSpec(
            num_scalar_prefetch=0,
            # co outermost: the weight tile is fetched once per co block and
            # stays VMEM-resident across every m tile (m is the inner,
            # sequential axis so the manual window-DMA chain is well ordered).
            grid=(num_co, num_m),
            in_specs=[
                pl.BlockSpec(memory_space=pl.ANY),                    # activations stay in HBM
                pl.BlockSpec((9, cin, tco), lambda co, m: (0, 0, co)),
                pl.BlockSpec((1, tco), lambda co, m: (0, co)),
                pl.BlockSpec((1, tco), lambda co, m: (0, co)),
            ],
            out_specs=pl.BlockSpec((tm, tco), lambda co, m: (m, co)),
            scratch_shapes=[
                pltpu.VMEM((2, win_rows, cin), jnp.bfloat16),   # double-buffered window
                pltpu.SemaphoreType.DMA((2,)),
                pltpu.VMEM((tm, tco), jnp.float32),             # f32 accumulator
            ],
        ),
        compiler_params=pltpu.CompilerParams(
            dimension_semantics=("parallel", "arbitrary"),
            vmem_limit_bytes=_VMEM_LIMIT,
        ),
    )(xp_flat, w9, scale, shift)

    # Drop the garbage columns/rows of the "wide" layout and the padded lanes.
    out = out[:m_total, :cout].reshape(N, Hp, Wp, cout)[:, :H, :W, :]
    return out


def conv1x1_softmax(x, w, b):
    """x:(N,H,W,Cin), w:(Cin,OC), b:(1,OC) -> channel softmax, (N,H,W,OC) f32."""
    N, H, W, cin = x.shape
    oc = w.shape[-1]
    oc_pad = 128                                  # lane-dense output stores
    p_total = N * H * W
    tm, num_m = _even_tile(p_total, _TM_MAX_GEMM)
    p_pad = num_m * tm

    xf = jnp.pad(x.reshape(p_total, cin).astype(jnp.bfloat16),
                 ((0, p_pad - p_total), (0, 0)))
    w_pad = jnp.zeros((cin, oc_pad), jnp.bfloat16).at[:, :oc].set(w.astype(jnp.bfloat16))
    b_pad = jnp.zeros((1, oc_pad), jnp.float32).at[:, :oc].set(b)

    kernel = functools.partial(_conv1x1_softmax_kernel, out_ch=oc)
    out = pl.pallas_call(
        kernel,
        out_shape=jax.ShapeDtypeStruct((p_pad, oc_pad), jnp.float32),
        grid_spec=pltpu.PrefetchScalarGridSpec(
            num_scalar_prefetch=0,
            grid=(num_m,),
            in_specs=[
                pl.BlockSpec((tm, cin), lambda m: (m, 0)),
                pl.BlockSpec((cin, oc_pad), lambda m: (0, 0)),
                pl.BlockSpec((1, oc_pad), lambda m: (0, 0)),
            ],
            out_specs=pl.BlockSpec((tm, oc_pad), lambda m: (m, 0)),
        ),
        compiler_params=pltpu.CompilerParams(
            dimension_semantics=("parallel",),
            vmem_limit_bytes=_VMEM_LIMIT,
        ),
    )(xf, w_pad, b_pad)

    return out[:p_total, :oc].reshape(N, H, W, oc)


# -----------------------------------------------------------------------------
# XLA layout glue (not compute)
# -----------------------------------------------------------------------------

def maxpool2x2(x):
    N, H, W, C = x.shape
    return x.reshape(N, H // 2, 2, W // 2, 2, C).max(axis=(2, 4))


def upsample2x(x):
    # nn.Upsample(scale_factor=2), default mode='nearest'
    return jnp.repeat(jnp.repeat(x, 2, axis=1), 2, axis=2)


# -----------------------------------------------------------------------------
# Parameter construction (deterministic; BatchNorm eval-mode folded to affine)
# -----------------------------------------------------------------------------

def _init_conv_unit(key, cin, cout):
    k = jax.random.split(key, 6)
    w = jax.random.normal(k[0], (3, 3, cin, cout), jnp.float32) / np.sqrt(9.0 * cin)
    b = 0.1 * jax.random.normal(k[1], (cout,), jnp.float32)
    gamma = 1.0 + 0.1 * jax.random.normal(k[2], (cout,), jnp.float32)
    beta = 0.1 * jax.random.normal(k[3], (cout,), jnp.float32)
    mean = 0.1 * jax.random.normal(k[4], (cout,), jnp.float32)
    var = jax.random.uniform(k[5], (cout,), jnp.float32, 0.5, 1.5)
    scale = gamma / jnp.sqrt(var + _BN_EPS)
    shift = (b - mean) * scale + beta
    return {"w": w, "scale": scale.reshape(1, cout), "shift": shift.reshape(1, cout)}


def _init_conv_block(key, cin, cout):
    k1, k2 = jax.random.split(key)
    return {"c1": _init_conv_unit(k1, cin, cout), "c2": _init_conv_unit(k2, cout, cout)}


def init_unet_params(key, img_ch=1, output_ch=1):
    names_blocks = [("Conv1", img_ch, 64), ("Conv2", 64, 128), ("Conv3", 128, 256),
                    ("Conv4", 256, 512), ("Conv5", 512, 1024),
                    ("Up_conv5", 1024, 512), ("Up_conv4", 512, 256),
                    ("Up_conv3", 256, 128), ("Up_conv2", 128, 64)]
    names_up = [("Up5", 1024, 512), ("Up4", 512, 256), ("Up3", 256, 128), ("Up2", 128, 64)]
    params = {}
    keys = jax.random.split(key, len(names_blocks) + len(names_up) + 1)
    i = 0
    for name, cin, cout in names_blocks:
        params[name] = _init_conv_block(keys[i], cin, cout); i += 1
    for name, cin, cout in names_up:
        params[name] = _init_conv_unit(keys[i], cin, cout); i += 1
    kh1, kh2 = jax.random.split(keys[i])
    params["Conv_1x1"] = {
        "w": jax.random.normal(kh1, (64, output_ch), jnp.float32) / np.sqrt(64.0),
        "b": 0.1 * jax.random.normal(kh2, (1, output_ch), jnp.float32),
    }
    return params


# -----------------------------------------------------------------------------
# Forward pass (mirrors U_Net.forward)
# -----------------------------------------------------------------------------

def _conv_block_apply(x, p):
    x = conv3x3_bn_relu(x, p["c1"]["w"], p["c1"]["scale"], p["c1"]["shift"])
    x = conv3x3_bn_relu(x, p["c2"]["w"], p["c2"]["scale"], p["c2"]["shift"])
    return x


def _up_conv_apply(x, p):
    x = upsample2x(x)
    return conv3x3_bn_relu(x, p["w"], p["scale"], p["shift"])


@jax.jit
def unet_forward(x_nchw, params):
    x = jnp.transpose(x_nchw, (0, 2, 3, 1)).astype(jnp.bfloat16)  # NCHW -> NHWC

    x1 = _conv_block_apply(x, params["Conv1"])
    x2 = _conv_block_apply(maxpool2x2(x1), params["Conv2"])
    x3 = _conv_block_apply(maxpool2x2(x2), params["Conv3"])
    x4 = _conv_block_apply(maxpool2x2(x3), params["Conv4"])
    x5 = _conv_block_apply(maxpool2x2(x4), params["Conv5"])

    d5 = _up_conv_apply(x5, params["Up5"])
    d5 = jnp.concatenate([x4, d5], axis=-1)
    d5 = _conv_block_apply(d5, params["Up_conv5"])

    d4 = _up_conv_apply(d5, params["Up4"])
    d4 = jnp.concatenate([x3, d4], axis=-1)
    d4 = _conv_block_apply(d4, params["Up_conv4"])

    d3 = _up_conv_apply(d4, params["Up3"])
    d3 = jnp.concatenate([x2, d3], axis=-1)
    d3 = _conv_block_apply(d3, params["Up_conv3"])

    d2 = _up_conv_apply(d3, params["Up2"])
    d2 = jnp.concatenate([x1, d2], axis=-1)
    d2 = _conv_block_apply(d2, params["Up_conv2"])

    d0 = conv1x1_softmax(d2, params["Conv_1x1"]["w"], params["Conv_1x1"]["b"])
    return jnp.transpose(d0, (0, 3, 1, 2))  # NHWC -> NCHW, f32


# -----------------------------------------------------------------------------
# Main
# -----------------------------------------------------------------------------

if __name__ == "__main__":
    key = jax.random.PRNGKey(0)
    k_param, k_x = jax.random.split(key)

    IMG_CH, OUTPUT_CH = 1, 2       # U_Net(img_ch=1, output_ch=2)
    N, H, W = 2, 16, 16            # 4 max-pools -> 1x1 bottleneck

    # --- relative-error check of both conv kernel paths vs lax.conv ---------
    for cin in (1, 64):
        kc = jax.random.split(jax.random.PRNGKey(cin + 1), 4)
        xt = jax.random.normal(kc[0], (2, 16, 16, cin), jnp.float32)
        wt = jax.random.normal(kc[1], (3, 3, cin, 64), jnp.float32) / np.sqrt(9.0 * cin)
        sc = 1.0 + 0.1 * jax.random.normal(kc[2], (1, 64), jnp.float32)
        sh = 0.1 * jax.random.normal(kc[3], (1, 64), jnp.float32)

        got = np.asarray(conv3x3_bn_relu(xt, wt, sc, sh).astype(jnp.float32))
        xb = xt.astype(jnp.bfloat16).astype(jnp.float32)
        wb = wt.astype(jnp.bfloat16).astype(jnp.float32)
        ref = jax.lax.conv_general_dilated(
            xb, wb, (1, 1), "SAME",
            dimension_numbers=("NHWC", "HWIO", "NHWC"),
            precision=jax.lax.Precision.HIGHEST)
        ref = np.asarray(jnp.maximum(ref * sc[None, None] + sh[None, None], 0.0))
        np.testing.assert_allclose(got, ref, rtol=4e-2, atol=5e-3)

    # --- full network --------------------------------------------------------
    params = init_unet_params(k_param, img_ch=IMG_CH, output_ch=OUTPUT_CH)
    x = jax.random.normal(k_x, (N, IMG_CH, H, W), jnp.float32)  # PyTorch-style NCHW

    out = unet_forward(x, params)
    out = jax.block_until_ready(out)

    assert out.shape == (N, OUTPUT_CH, H, W), out.shape
    # softmax over channel dim must sum to 1
    assert np.allclose(np.asarray(jnp.sum(out, axis=1)), 1.0, atol=1e-5)
    print("KERNEL_OK")
</pallas_src>

<mosaic_0001>
module attributes {stable_mosaic.version = 11 : i64} {
  func.func @_gemm_bn_relu_kernel(%arg0: i32, %arg1: i32, %arg2: memref<512x9xbf16, #tpu.memory_space<vmem>>, %arg3: memref<9x128xbf16, #tpu.memory_space<vmem>>, %arg4: memref<1x128xf32, #tpu.memory_space<vmem>>, %arg5: memref<1x128xf32, #tpu.memory_space<vmem>>, %arg6: memref<512x128xbf16, #tpu.memory_space<vmem>>) attributes {dimension_semantics = [#tpu.dimension_semantics<parallel>, #tpu.dimension_semantics<parallel>], iteration_bounds = array<i64: 1, 1>, scalar_prefetch = 0 : i64, scratch_operands = 0 : i64, tpu.core_type = #tpu.core_type<tc>, window_params = [{transform_indices = @transform_0, window_bounds = array<i64: 512, 9>}, {transform_indices = @transform_1, window_bounds = array<i64: 9, 128>}, {transform_indices = @transform_2, window_bounds = array<i64: 1, 128>}, {transform_indices = @transform_3, window_bounds = array<i64: 1, 128>}, {transform_indices = @transform_4, window_bounds = array<i64: 512, 128>}]} {
    %c0 = arith.constant 0 : index
    %c0_0 = arith.constant 0 : index
    %0 = vector.load %arg2[%c0, %c0_0] : memref<512x9xbf16, #tpu.memory_space<vmem>>, vector<512x9xbf16>
    %c0_1 = arith.constant 0 : index
    %c0_2 = arith.constant 0 : index
    %1 = vector.load %arg3[%c0_1, %c0_2] : memref<9x128xbf16, #tpu.memory_space<vmem>>, vector<9x128xbf16>
    %cst = arith.constant dense<0.000000e+00> : vector<512x128xf32>
    %2 = tpu.matmul %0, %1, %cst {dimension_numbers = #tpu.dot_dimension_numbers<[1], [0], [0], [1], [0, 0, 1, 1], [], []>} : vector<512x9xbf16>, vector<9x128xbf16>, vector<512x128xf32> -> vector<512x128xf32>
    %c0_3 = arith.constant 0 : index
    %c0_4 = arith.constant 0 : index
    %3 = vector.load %arg4[%c0_3, %c0_4] : memref<1x128xf32, #tpu.memory_space<vmem>>, vector<1x128xf32>
    %4 = vector.broadcast %3 : vector<1x128xf32> to vector<512x128xf32>
    %5 = arith.mulf %2, %4 : vector<512x128xf32>
    %c0_5 = arith.constant 0 : index
    %c0_6 = arith.constant 0 : index
    %6 = vector.load %arg5[%c0_5, %c0_6] : memref<1x128xf32, #tpu.memory_space<vmem>>, vector<1x128xf32>
    %7 = vector.broadcast %6 : vector<1x128xf32> to vector<512x128xf32>
    %8 = arith.addf %5, %7 : vector<512x128xf32>
    %cst_7 = arith.constant 0.000000e+00 : f32
    %9 = vector.broadcast %cst_7 : f32 to vector<512x128xf32>
    %10 = arith.maximumf %8, %9 : vector<512x128xf32>
    %11 = arith.truncf %10 : vector<512x128xf32> to vector<512x128xbf16>
    %c0_8 = arith.constant 0 : index
    %c0_9 = arith.constant 0 : index
    %12 = vector.load %arg6[%c0_8, %c0_9] : memref<512x128xbf16, #tpu.memory_space<vmem>>, vector<512x128xbf16>
    tpu.vector_store %arg6[%c0_8, %c0_9], %11 {strides = array<i32>} : memref<512x128xbf16, #tpu.memory_space<vmem>>, vector<512x128xbf16>,
    return
  }
  func.func @transform_0(%arg0: i32, %arg1: i32) -> (i32, i32) {
    %c0_i32 = arith.constant 0 : i32
    %c0_i32_0 = arith.constant 0 : i32
    return %arg1, %c0_i32 : i32, i32
  }
  func.func @transform_1(%arg0: i32, %arg1: i32) -> (i32, i32) {
    %c0_i32 = arith.constant 0 : i32
    %c0_i32_0 = arith.constant 0 : i32
    return %c0_i32, %arg0 : i32, i32
  }
  func.func @transform_2(%arg0: i32, %arg1: i32) -> (i32, i32) {
    %c0_i32 = arith.constant 0 : i32
    %c0_i32_0 = arith.constant 0 : i32
    return %c0_i32, %arg0 : i32, i32
  }
  func.func @transform_3(%arg0: i32, %arg1: i32) -> (i32, i32) {
    %c0_i32 = arith.constant 0 : i32
    %c0_i32_0 = arith.constant 0 : i32
    return %c0_i32, %arg0 : i32, i32
  }
  func.func @transform_4(%arg0: i32, %arg1: i32) -> (i32, i32) {
    %c0_i32 = arith.constant 0 : i32
    return %arg1, %arg0 : i32, i32
  }
}

</mosaic_0001>

<bundles_post_ra>
// kernel: tpu_custom_call.1
= control target key start
LH: loop header
LB: loop body
LE: loop exit
PB: predicated region body
PF: predicated region fallthrough
CT: control target
= control target key end

     0   :  { %vm347_vm0 = vcmask 1043456   ;;  %vm348_vm1 = vcmask 1044480   ;;  %v1733_v2 = vmov 65535   ;;  %vm250_vm2 = vcmask 72704   ;;  %s2043_s0 = inlined_call_operand.vmem [shape: bf16[512,9], index: 0, kind: input, shape index: {}]   ;;  %s2044_s1 = inlined_call_operand.vmem [shape: bf16[9,128], index: 1, kind: input, shape index: {}]   ;;  %s2045_s2 = inlined_call_operand.vmem [shape: f32[1,128], index: 2, kind: input, shape index: {}]   ;;  %s2046_s3 = inlined_call_operand.vmem [shape: f32[1,128], index: 3, kind: input, shape index: {}]   ;;  %s2047_s4 = inlined_call_operand.hbm [shape: bf16[512,128], index: 4, kind: output, shape index: {}]  }
   0x1   :  { %v1676_v0 = vld [vmem:[%s2044_s1] sm:$0x1f]   ;;  %v349_v3 = vsel %vm347_vm0, 4294967295, %v1733_v2  ;;  %v1679_v7 = vld [vmem:[%s2043_s0 + $0x8] sm:$0xff]   ;;  %v1681_v9 = vld [vmem:[%s2043_s0 + $0x10] sm:$0xff]  }
   0x2   :  { %v1677_v1 = vld [vmem:[%s2043_s0] sm:$0xff]   ;;  %v350_v4 = vsel %vm348_vm1, %v349_v3, 0  ;;  %v1680_v8 = vld [vmem:[%s2043_s0 + $0x88] sm:$0xff]   ;;  %v1682_v10 = vld [vmem:[%s2043_s0 + $0x90] sm:$0xff]  }
   0x3   :  { %1606 = vmatprep.mubr.msk.bf16.mxu0 %vm250_vm2, %v1677_v1  ;;  %v1678_v5 = vld [vmem:[%s2043_s0 + $0x80] sm:$0xff]   ;;  %v352_v6 = vand.u32 %v1676_v0, %v350_v4  ;;  %v1683_v11 = vld [vmem:[%s2043_s0 + $0x18] sm:$0xff]   ;;  %v1687_v15 = vld [vmem:[%s2043_s0 + $0x28] sm:$0xff]  }
   0x4   :  { %1638 = vmatprep.mubr.msk.bf16.mxu1 %vm250_vm2, %v1678_v5  ;;  %v1684_v12 = vld [vmem:[%s2043_s0 + $0x98] sm:$0xff]   ;;  %v1685_v13 = vld [vmem:[%s2043_s0 + $0x20] sm:$0xff]   ;;  %v1688_v16 = vld [vmem:[%s2043_s0 + $0xa8] sm:$0xff]  }
   0x5   :  { %1604 = vmatprep.subr.bf16.mxu0 %v352_v6  ;;  %1670 = vmatprep.subr.bf16.mxu1 %v352_v6  ;;  %v1686_v14 = vld [vmem:[%s2043_s0 + $0xa0] sm:$0xff]   ;;  %v1689_v17 = vld [vmem:[%s2043_s0 + $0x30] sm:$0xff]   ;;  %v1691_v19 = vld [vmem:[%s2043_s0 + $0x38] sm:$0xff]  }
   0x6   :  { %1605 = vmatpush3.bf16.msra.mxu0 %v352_v6  ;;  %1671 = vmatpush3.bf16.msra.mxu1 %v352_v6  ;;  %v1690_v18 = vld [vmem:[%s2043_s0 + $0xb0] sm:$0xff]   ;;  %v1692_v20 = vld [vmem:[%s2043_s0 + $0xb8] sm:$0xff]   ;;  %v1693_v21 = vld [vmem:[%s2043_s0 + $0x40] sm:$0xff]  }
   0x7   :  { %v1694_v22 = vld [vmem:[%s2043_s0 + $0xc0] sm:$0xff]  }
   0x9   :  { %1607 = vmatmul.mubr.msk.bf16.vlgmr.msra.gmra.mrb[0].mxu0 %vm250_vm2, %v1679_v7  ;;  %1639 = vmatmul.mubr.msk.bf16.vlgmr.msra.gmra.mrb[0].mxu1 %vm250_vm2, %v1680_v8 }
   0xa   :  { %1610 = vmatprep.mubr.msk.bf16.mxu0 %vm250_vm2, %v1681_v9  ;;  %1642 = vmatprep.mubr.msk.bf16.mxu1 %vm250_vm2, %v1682_v10 }
  0x11   :  { %1611 = vmatmul.mubr.msk.bf16.gmra.mrb[4].mxu0 %vm250_vm2, %v1683_v11  ;;  %1643 = vmatmul.mubr.msk.bf16.gmra.mrb[4].mxu1 %vm250_vm2, %v1684_v12 }
  0x12   :  { %1614 = vmatprep.mubr.msk.bf16.mxu0 %vm250_vm2, %v1685_v13  ;;  %1646 = vmatprep.mubr.msk.bf16.mxu1 %vm250_vm2, %v1686_v14 }
  0x19   :  { %1615 = vmatmul.mubr.msk.bf16.gmra.mrb[8].mxu0 %vm250_vm2, %v1687_v15  ;;  %1647 = vmatmul.mubr.msk.bf16.gmra.mrb[8].mxu1 %vm250_vm2, %v1688_v16 }
  0x1a   :  { %1618 = vmatprep.mubr.msk.bf16.mxu0 %vm250_vm2, %v1689_v17  ;;  %1650 = vmatprep.mubr.msk.bf16.mxu1 %vm250_vm2, %v1690_v18 }
  0x1b   :  { %9 = vsyncpa [#allocation3], 0  ;;  %v1695_v23 = vld [vmem:[%s2043_s0 + $0x48] sm:$0xff]   ;;  %v1697_v25 = vld [vmem:[%s2043_s0 + $0x50] sm:$0xff]  }
  0x1c   :  { %v1696_v24 = vld [vmem:[%s2043_s0 + $0xc8] sm:$0xff]   ;;  %v1698_v26 = vld [vmem:[%s2043_s0 + $0xd0] sm:$0xff]   ;;  %v1699_v27 = vld [vmem:[%s2043_s0 + $0x58] sm:$0xff]  }
  0x1d   :  { %v1700_v28 = vld [vmem:[%s2043_s0 + $0xd8] sm:$0xff]   ;;  %v1701_v29 = vld [vmem:[%s2043_s0 + $0x60] sm:$0xff]   ;;  %v1703_v31 = vld [vmem:[%s2043_s0 + $0x68] sm:$0xff]  }
  0x1e   :  { %v1702_v30 = vld [vmem:[%s2043_s0 + $0xe0] sm:$0xff]   ;;  %v1704_v32 = vld [vmem:[%s2043_s0 + $0xe8] sm:$0xff]   ;;  %v1705_v33 = vld [vmem:[%s2043_s0 + $0x70] sm:$0xff]  }
  0x1f   :  { %v1706_v34 = vld [vmem:[%s2043_s0 + $0xf0] sm:$0xff]   ;;  %v1707_v35 = vld [vmem:[%s2043_s0 + $0x78] sm:$0xff]   ;;  %v1896_v37 = vld [vmem:[%s2045_s2] ss:$0 sm:$0xff] }
  0x20   :  { %v1708_v36 = vld [vmem:[%s2043_s0 + $0xf8] sm:$0xff]   ;;  %v1901_v39 = vld [vmem:[%s2046_s3] ss:$0 sm:$0xff]  ;;  %s1734_s0 = smov [#allocation2]  }
  0x21   :  { %1619 = vmatmul.mubr.msk.bf16.gmra.mrb[12].mxu0 %vm250_vm2, %v1691_v19  ;;  %1651 = vmatmul.mubr.msk.bf16.gmra.mrb[12].mxu1 %vm250_vm2, %v1692_v20  ;;  %s1174_s2 = sshll.u32 %s1734_s0, 4  ;;  %s1175_s2 = int_to_ptr.vmem [resolvable:$true] %s1174_s2 }
  0x22   :  { %1622 = vmatprep.mubr.msk.bf16.mxu0 %vm250_vm2, %v1693_v21  ;;  %1654 = vmatprep.mubr.msk.bf16.mxu1 %vm250_vm2, %v1694_v22  ;;  %s1709_s3 = scalar_lea.vmem %s1175_s2, 4096  ;;  %p1714_p1 = scmp.lt.s32.totalorder %s1175_s2, %s1175_s2 }
  0x23   :  { %p1710_p0 = scmp.ne.s32.totalorder %s1175_s2, %s1709_s3  ;;  %p1715_p2 = scmp.lt.s32.totalorder %s1709_s3, %s1709_s3 }
  0x25   :  { %p1716_p3 = por %p1715_p2, %p1714_p1 }
  0x27   :  { %p1717_p4 = pnand %p1716_p3, %p1710_p0 }
  0x29   :  { %1623 = vmatmul.mubr.msk.bf16.gmra.mrb[16].mxu0 %vm250_vm2, %v1695_v23  ;;  %1655 = vmatmul.mubr.msk.bf16.gmra.mrb[16].mxu1 %vm250_vm2, %v1696_v24 }
  0x2a   :  { %1626 = vmatprep.mubr.msk.bf16.mxu0 %vm250_vm2, %v1697_v25  ;;  %1658 = vmatprep.mubr.msk.bf16.mxu1 %vm250_vm2, %v1698_v26 }
  0x31   :  { %1627 = vmatmul.mubr.msk.bf16.gmra.mrb[20].mxu0 %vm250_vm2, %v1699_v27  ;;  %1659 = vmatmul.mubr.msk.bf16.gmra.mrb[20].mxu1 %vm250_vm2, %v1700_v28 }
  0x32   :  { %1630 = vmatprep.mubr.msk.bf16.mxu0 %vm250_vm2, %v1701_v29  ;;  %1662 = vmatprep.mubr.msk.bf16.mxu1 %vm250_vm2, %v1702_v30 }
  0x39   :  { %1631 = vmatmul.mubr.msk.bf16.gmra.mrb[24].mxu0 %vm250_vm2, %v1703_v31  ;;  %1663 = vmatmul.mubr.msk.bf16.gmra.mrb[24].mxu1 %vm250_vm2, %v1704_v32 }
  0x3a   :  { %1634 = vmatprep.mubr.msk.bf16.mxu0 %vm250_vm2, %v1705_v33  ;;  %1666 = vmatprep.mubr.msk.bf16.mxu1 %vm250_vm2, %v1706_v34 }
  0x41   :  { %1635 = vmatmul.mubr.msk.bf16.gmra.mrb[28].mxu0 %vm250_vm2, %v1707_v35  ;;  %1667 = vmatmul.mubr.msk.bf16.gmra.mrb[28].mxu1 %vm250_vm2, %v1708_v36 }
  0xdc   :  { %v1608_v38 = vpop.f32.mrb[0].mxu0  ;;  %v1640_v40 = vpop.f32.mrb[0].mxu1 }
  0xdd   :  { %v652_v41 = vmul.f32 %v1608_v38, %v1896_v37  ;;  %v684_v42 = vmul.f32 %v1640_v40, %v1896_v37  ;;  %v388_v43 = vpop.f32.mrb[1].mxu0  ;;  %v516_v44 = vpop.f32.mrb[1].mxu1 }
  0xde   :  { %v650_v45 = vmul.f32 %v1896_v37, %v388_v43  ;;  %v682_v46 = vmul.f32 %v1896_v37, %v516_v44  ;;  %v1609_v47 = vpop.f32.mrb[2].mxu0  ;;  %v1641_v48 = vpop.f32.mrb[2].mxu1 }
  0xdf   :  { %v723_v49 = vadd.f32 %v1901_v39, %v652_v41  ;;  %v755_v50 = vadd.f32 %v1901_v39, %v684_v42  ;;  %v653_v51 = vmul.f32 %v1609_v47, %v1896_v37  ;;  %v685_v52 = vmul.f32 %v1641_v48, %v1896_v37  ;;  %v391_v53 = vpop.f32.mrb[3].mxu0  ;;  %v519_v54 = vpop.f32.mrb[3].mxu1 }
  0xe0   :  { %v721_v55 = vadd.f32 %v1901_v39, %v650_v45  ;;  %v753_v56 = vadd.f32 %v1901_v39, %v682_v46  ;;  %v651_v57 = vmul.f32 %v1896_v37, %v391_v53  ;;  %v683_v58 = vmul.f32 %v1896_v37, %v519_v54 }
  0xe1   :  { %v724_v59 = vadd.f32 %v1901_v39, %v653_v51  ;;  %v756_v60 = vadd.f32 %v1901_v39, %v685_v52  ;;  %v787_v63 = vmax.f32 %v723_v49, 0.0  ;;  %v819_v0 = vmax.f32 %v755_v50, 0.0 }
  0xe2   :  { %v722_v61 = vadd.f32 %v1901_v39, %v651_v57  ;;  %v754_v62 = vadd.f32 %v1901_v39, %v683_v58  ;;  %v785_v3 = vmax.f32 %v721_v55, 0.0  ;;  %v817_v4 = vmax.f32 %v753_v56, 0.0 }
  0xe3   :  { %v788_v1 = vmax.f32 %v724_v59, 0.0  ;;  %v820_v2 = vmax.f32 %v756_v60, 0.0 }
  0xe4   :  { %v786_v5 = vmax.f32 %v722_v61, 0.0  ;;  %v818_v6 = vmax.f32 %v754_v62, 0.0  ;;  %v1612_v7 = vpop.f32.mrb[4].mxu0  ;;  %v1644_v8 = vpop.f32.mrb[4].mxu1 }
  0xe5   :  { %v1388_v9 = vpack.c.bf16 %v788_v1, %v787_v63  ;;  %v1468_v10 = vpack.c.bf16 %v820_v2, %v819_v0  ;;  %v656_v11 = vmul.f32 %v1612_v7, %v1896_v37  ;;  %v688_v12 = vmul.f32 %v1644_v8, %v1896_v37  ;;  %v404_v13 = vpop.f32.mrb[5].mxu0  ;;  %v532_v14 = vpop.f32.mrb[5].mxu1 }
  0xe6   :  { %v1383_v15 = vpack.c.bf16 %v786_v5, %v785_v3  ;;  %v1463_v16 = vpack.c.bf16 %v818_v6, %v817_v4  ;;  %v654_v17 = vmul.f32 %v1896_v37, %v404_v13  ;;  %v686_v18 = vmul.f32 %v1896_v37, %v532_v14  ;;  %v1613_v19 = vpop.f32.mrb[6].mxu0  ;;  %v1645_v20 = vpop.f32.mrb[6].mxu1 }
  0xe7   :  { %1540 = vst [vmem:[#allocation2 + $0x8] sm:$0xff] %v1388_v9   ;;  %1556 = vst [vmem:[#allocation2 + $0x88] sm:$0xff] %v1468_v10   ;;  %v727_v21 = vadd.f32 %v1901_v39, %v656_v11  ;;  %v759_v22 = vadd.f32 %v1901_v39, %v688_v12  ;;  %v657_v23 = vmul.f32 %v1613_v19, %v1896_v37  ;;  %v407_v25 = vpop.f32.mrb[7].mxu0  ;;  %v535_v26 = vpop.f32.mrb[7].mxu1 }
  0xe8   :  { %v689_v24 = vmul.f32 %v1645_v20, %v1896_v37  ;;  %1384 = vst [vmem:[#allocation2] sm:$0xff] %v1383_v15   ;;  %1555 = vst [vmem:[#allocation2 + $0x80] sm:$0xff] %v1463_v16   ;;  %v725_v27 = vadd.f32 %v1901_v39, %v654_v17  ;;  %v757_v28 = vadd.f32 %v1901_v39, %v686_v18 }
  0xe9   :  { %v655_v29 = vmul.f32 %v1896_v37, %v407_v25  ;;  %v687_v30 = vmul.f32 %v1896_v37, %v535_v26  ;;  %v728_v31 = vadd.f32 %v1901_v39, %v657_v23  ;;  %v791_v35 = vmax.f32 %v727_v21, 0.0 }
  0xea   :  { %v760_v32 = vadd.f32 %v1901_v39, %v689_v24  ;;  %v823_v36 = vmax.f32 %v759_v22, 0.0  ;;  %v789_v41 = vmax.f32 %v725_v27, 0.0  ;;  %v821_v42 = vmax.f32 %v757_v28, 0.0 }
  0xeb   :  { %v726_v33 = vadd.f32 %v1901_v39, %v655_v29  ;;  %v758_v34 = vadd.f32 %v1901_v39, %v687_v30  ;;  %v792_v38 = vmax.f32 %v728_v31, 0.0 }
  0xec   :  { %v824_v40 = vmax.f32 %v760_v32, 0.0  ;;  %v1616_v45 = vpop.f32.mrb[8].mxu0  ;;  %v1648_v46 = vpop.f32.mrb[8].mxu1 }
  0xed   :  { %v790_v43 = vmax.f32 %v726_v33, 0.0  ;;  %v822_v44 = vmax.f32 %v758_v34, 0.0  ;;  %v1398_v47 = vpack.c.bf16 %v792_v38, %v791_v35  ;;  %v660_v49 = vmul.f32 %v1616_v45, %v1896_v37  ;;  %v420_v51 = vpop.f32.mrb[9].mxu0  ;;  %v548_v52 = vpop.f32.mrb[9].mxu1 }
  0xee   :  { %v1478_v48 = vpack.c.bf16 %v824_v40, %v823_v36  ;;  %v692_v50 = vmul.f32 %v1648_v46, %v1896_v37  ;;  %v658_v55 = vmul.f32 %v1896_v37, %v420_v51  ;;  %v690_v56 = vmul.f32 %v1896_v37, %v548_v52  ;;  %v1617_v57 = vpop.f32.mrb[10].mxu0  ;;  %v1649_v58 = vpop.f32.mrb[10].mxu1 }
  0xef   :  { %v1393_v53 = vpack.c.bf16 %v790_v43, %v789_v41  ;;  %v1473_v54 = vpack.c.bf16 %v822_v44, %v821_v42  ;;  %1542 = vst [vmem:[#allocation2 + $0x18] sm:$0xff] %v1398_v47   ;;  %v731_v59 = vadd.f32 %v1901_v39, %v660_v49  ;;  %v661_v61 = vmul.f32 %v1617_v57, %v1896_v37  ;;  %v423_v63 = vpop.f32.mrb[11].mxu0  ;;  %v551_v0 = vpop.f32.mrb[11].mxu1 }
  0xf0   :  { %1558 = vst [vmem:[#allocation2 + $0x98] sm:$0xff] %v1478_v48   ;;  %v763_v60 = vadd.f32 %v1901_v39, %v692_v50  ;;  %v693_v62 = vmul.f32 %v1649_v58, %v1896_v37  ;;  %v729_v1 = vadd.f32 %v1901_v39, %v658_v55  ;;  %v761_v2 = vadd.f32 %v1901_v39, %v690_v56 }
  0xf1   :  { %1541 = vst [vmem:[#allocation2 + $0x10] sm:$0xff] %v1393_v53   ;;  %1557 = vst [vmem:[#allocation2 + $0x90] sm:$0xff] %v1473_v54   ;;  %v659_v3 = vmul.f32 %v1896_v37, %v423_v63  ;;  %v691_v4 = vmul.f32 %v1896_v37, %v551_v0  ;;  %v732_v5 = vadd.f32 %v1901_v39, %v661_v61  ;;  %v795_v9 = vmax.f32 %v731_v59, 0.0 }
  0xf2   :  { %v764_v6 = vadd.f32 %v1901_v39, %v693_v62  ;;  %v827_v10 = vmax.f32 %v763_v60, 0.0  ;;  %v793_v13 = vmax.f32 %v729_v1, 0.0  ;;  %v825_v14 = vmax.f32 %v761_v2, 0.0 }
  0xf3   :  { %v730_v7 = vadd.f32 %v1901_v39, %v659_v3  ;;  %v762_v8 = vadd.f32 %v1901_v39, %v691_v4  ;;  %v796_v11 = vmax.f32 %v732_v5, 0.0 }
  0xf4   :  { %v828_v12 = vmax.f32 %v764_v6, 0.0  ;;  %v1620_v17 = vpop.f32.mrb[12].mxu0  ;;  %v1652_v18 = vpop.f32.mrb[12].mxu1 }
  0xf5   :  { %v794_v15 = vmax.f32 %v730_v7, 0.0  ;;  %v826_v16 = vmax.f32 %v762_v8, 0.0  ;;  %v1408_v19 = vpack.c.bf16 %v796_v11, %v795_v9  ;;  %v664_v21 = vmul.f32 %v1620_v17, %v1896_v37  ;;  %v436_v23 = vpop.f32.mrb[13].mxu0  ;;  %v564_v24 = vpop.f32.mrb[13].mxu1 }
  0xf6   :  { %v1488_v20 = vpack.c.bf16 %v828_v12, %v827_v10  ;;  %v696_v22 = vmul.f32 %v1652_v18, %v1896_v37  ;;  %v662_v27 = vmul.f32 %v1896_v37, %v436_v23  ;;  %v694_v28 = vmul.f32 %v1896_v37, %v564_v24  ;;  %v1621_v29 = vpop.f32.mrb[14].mxu0  ;;  %v1653_v30 = vpop.f32.mrb[14].mxu1 }
  0xf7   :  { %v1403_v25 = vpack.c.bf16 %v794_v15, %v793_v13  ;;  %v1483_v26 = vpack.c.bf16 %v826_v16, %v825_v14  ;;  %1544 = vst [vmem:[#allocation2 + $0x28] sm:$0xff] %v1408_v19   ;;  %v735_v31 = vadd.f32 %v1901_v39, %v664_v21  ;;  %v665_v33 = vmul.f32 %v1621_v29, %v1896_v37  ;;  %v439_v35 = vpop.f32.mrb[15].mxu0  ;;  %v567_v36 = vpop.f32.mrb[15].mxu1 }
  0xf8   :  { %1560 = vst [vmem:[#allocation2 + $0xa8] sm:$0xff] %v1488_v20   ;;  %v767_v32 = vadd.f32 %v1901_v39, %v696_v22  ;;  %v697_v34 = vmul.f32 %v1653_v30, %v1896_v37  ;;  %v733_v38 = vadd.f32 %v1901_v39, %v662_v27  ;;  %v765_v40 = vadd.f32 %v1901_v39, %v694_v28 }
  0xf9   :  { %1543 = vst [vmem:[#allocation2 + $0x20] sm:$0xff] %v1403_v25   ;;  %1559 = vst [vmem:[#allocation2 + $0xa0] sm:$0xff] %v1483_v26   ;;  %v663_v41 = vmul.f32 %v1896_v37, %v439_v35  ;;  %v695_v42 = vmul.f32 %v1896_v37, %v567_v36  ;;  %v736_v43 = vadd.f32 %v1901_v39, %v665_v33  ;;  %v799_v47 = vmax.f32 %v735_v31, 0.0 }
  0xfa   :  { %v768_v44 = vadd.f32 %v1901_v39, %v697_v34  ;;  %v831_v48 = vmax.f32 %v767_v32, 0.0  ;;  %v797_v51 = vmax.f32 %v733_v38, 0.0  ;;  %v829_v52 = vmax.f32 %v765_v40, 0.0 }
  0xfb   :  { %v734_v45 = vadd.f32 %v1901_v39, %v663_v41  ;;  %v766_v46 = vadd.f32 %v1901_v39, %v695_v42  ;;  %v800_v49 = vmax.f32 %v736_v43, 0.0 }
  0xfc   :  { %v832_v50 = vmax.f32 %v768_v44, 0.0  ;;  %v1624_v55 = vpop.f32.mrb[16].mxu0  ;;  %v1656_v56 = vpop.f32.mrb[16].mxu1 }
  0xfd   :  { %v798_v53 = vmax.f32 %v734_v45, 0.0  ;;  %v830_v54 = vmax.f32 %v766_v46, 0.0  ;;  %v1418_v57 = vpack.c.bf16 %v800_v49, %v799_v47  ;;  %v668_v59 = vmul.f32 %v1624_v55, %v1896_v37  ;;  %v452_v61 = vpop.f32.mrb[17].mxu0  ;;  %v580_v62 = vpop.f32.mrb[17].mxu1 }
  0xfe   :  { %v1498_v58 = vpack.c.bf16 %v832_v50, %v831_v48  ;;  %v700_v60 = vmul.f32 %v1656_v56, %v1896_v37  ;;  %v666_v1 = vmul.f32 %v1896_v37, %v452_v61  ;;  %v698_v2 = vmul.f32 %v1896_v37, %v580_v62  ;;  %v1625_v3 = vpop.f32.mrb[18].mxu0  ;;  %v1657_v4 = vpop.f32.mrb[18].mxu1 }
  0xff   :  { %v1413_v63 = vpack.c.bf16 %v798_v53, %v797_v51  ;;  %v1493_v0 = vpack.c.bf16 %v830_v54, %v829_v52  ;;  %1546 = vst [vmem:[#allocation2 + $0x38] sm:$0xff] %v1418_v57   ;;  %v739_v5 = vadd.f32 %v1901_v39, %v668_v59  ;;  %v669_v7 = vmul.f32 %v1625_v3, %v1896_v37  ;;  %v455_v9 = vpop.f32.mrb[19].mxu0  ;;  %v583_v10 = vpop.f32.mrb[19].mxu1 }
 0x100   :  { %1562 = vst [vmem:[#allocation2 + $0xb8] sm:$0xff] %v1498_v58   ;;  %v771_v6 = vadd.f32 %v1901_v39, %v700_v60  ;;  %v701_v8 = vmul.f32 %v1657_v4, %v1896_v37  ;;  %v737_v11 = vadd.f32 %v1901_v39, %v666_v1  ;;  %v769_v12 = vadd.f32 %v1901_v39, %v698_v2 }
 0x101   :  { %1545 = vst [vmem:[#allocation2 + $0x30] sm:$0xff] %v1413_v63   ;;  %1561 = vst [vmem:[#allocation2 + $0xb0] sm:$0xff] %v1493_v0   ;;  %v667_v13 = vmul.f32 %v1896_v37, %v455_v9  ;;  %v699_v14 = vmul.f32 %v1896_v37, %v583_v10  ;;  %v740_v15 = vadd.f32 %v1901_v39, %v669_v7  ;;  %v803_v19 = vmax.f32 %v739_v5, 0.0 }
 0x102   :  { %v772_v16 = vadd.f32 %v1901_v39, %v701_v8  ;;  %v835_v20 = vmax.f32 %v771_v6, 0.0  ;;  %v801_v23 = vmax.f32 %v737_v11, 0.0  ;;  %v833_v24 = vmax.f32 %v769_v12, 0.0 }
 0x103   :  { %v738_v17 = vadd.f32 %v1901_v39, %v667_v13  ;;  %v770_v18 = vadd.f32 %v1901_v39, %v699_v14  ;;  %v804_v21 = vmax.f32 %v740_v15, 0.0 }
 0x104   :  { %v836_v22 = vmax.f32 %v772_v16, 0.0  ;;  %v1628_v27 = vpop.f32.mrb[20].mxu0  ;;  %v1660_v28 = vpop.f32.mrb[20].mxu1 }
 0x105   :  { %v802_v25 = vmax.f32 %v738_v17, 0.0  ;;  %v834_v26 = vmax.f32 %v770_v18, 0.0  ;;  %v1428_v29 = vpack.c.bf16 %v804_v21, %v803_v19  ;;  %v672_v31 = vmul.f32 %v1628_v27, %v1896_v37  ;;  %v468_v33 = vpop.f32.mrb[21].mxu0  ;;  %v596_v34 = vpop.f32.mrb[21].mxu1 }
 0x106   :  { %v1508_v30 = vpack.c.bf16 %v836_v22, %v835_v20  ;;  %v704_v32 = vmul.f32 %v1660_v28, %v1896_v37  ;;  %v670_v38 = vmul.f32 %v1896_v37, %v468_v33  ;;  %v702_v40 = vmul.f32 %v1896_v37, %v596_v34  ;;  %v1629_v41 = vpop.f32.mrb[22].mxu0  ;;  %v1661_v42 = vpop.f32.mrb[22].mxu1 }
 0x107   :  { %v1423_v35 = vpack.c.bf16 %v802_v25, %v801_v23  ;;  %v1503_v36 = vpack.c.bf16 %v834_v26, %v833_v24  ;;  %1548 = vst [vmem:[#allocation2 + $0x48] sm:$0xff] %v1428_v29   ;;  %v743_v43 = vadd.f32 %v1901_v39, %v672_v31  ;;  %v673_v45 = vmul.f32 %v1629_v41, %v1896_v37  ;;  %v471_v47 = vpop.f32.mrb[23].mxu0  ;;  %v599_v48 = vpop.f32.mrb[23].mxu1 }
 0x108   :  { %1564 = vst [vmem:[#allocation2 + $0xc8] sm:$0xff] %v1508_v30   ;;  %v775_v44 = vadd.f32 %v1901_v39, %v704_v32  ;;  %v705_v46 = vmul.f32 %v1661_v42, %v1896_v37  ;;  %v741_v49 = vadd.f32 %v1901_v39, %v670_v38  ;;  %v773_v50 = vadd.f32 %v1901_v39, %v702_v40 }
 0x109   :  { %1547 = vst [vmem:[#allocation2 + $0x40] sm:$0xff] %v1423_v35   ;;  %1563 = vst [vmem:[#allocation2 + $0xc0] sm:$0xff] %v1503_v36   ;;  %v671_v51 = vmul.f32 %v1896_v37, %v471_v47  ;;  %v703_v52 = vmul.f32 %v1896_v37, %v599_v48  ;;  %v744_v53 = vadd.f32 %v1901_v39, %v673_v45  ;;  %v807_v57 = vmax.f32 %v743_v43, 0.0 }
 0x10a   :  { %v776_v54 = vadd.f32 %v1901_v39, %v705_v46  ;;  %v839_v58 = vmax.f32 %v775_v44, 0.0  ;;  %v805_v61 = vmax.f32 %v741_v49, 0.0  ;;  %v837_v62 = vmax.f32 %v773_v50, 0.0 }
 0x10b   :  { %v742_v55 = vadd.f32 %v1901_v39, %v671_v51  ;;  %v774_v56 = vadd.f32 %v1901_v39, %v703_v52  ;;  %v808_v59 = vmax.f32 %v744_v53, 0.0 }
 0x10c   :  { %v840_v60 = vmax.f32 %v776_v54, 0.0  ;;  %v1632_v1 = vpop.f32.mrb[24].mxu0  ;;  %v1664_v2 = vpop.f32.mrb[24].mxu1 }
 0x10d   :  { %v806_v63 = vmax.f32 %v742_v55, 0.0  ;;  %v838_v0 = vmax.f32 %v774_v56, 0.0  ;;  %v1438_v3 = vpack.c.bf16 %v808_v59, %v807_v57  ;;  %v676_v5 = vmul.f32 %v1632_v1, %v1896_v37  ;;  %v484_v7 = vpop.f32.mrb[25].mxu0  ;;  %v612_v8 = vpop.f32.mrb[25].mxu1 }
 0x10e   :  { %v1518_v4 = vpack.c.bf16 %v840_v60, %v839_v58  ;;  %v708_v6 = vmul.f32 %v1664_v2, %v1896_v37  ;;  %v674_v11 = vmul.f32 %v1896_v37, %v484_v7  ;;  %v706_v12 = vmul.f32 %v1896_v37, %v612_v8  ;;  %v1633_v13 = vpop.f32.mrb[26].mxu0  ;;  %v1665_v14 = vpop.f32.mrb[26].mxu1 }
 0x10f   :  { %v1433_v9 = vpack.c.bf16 %v806_v63, %v805_v61  ;;  %v1513_v10 = vpack.c.bf16 %v838_v0, %v837_v62  ;;  %1550 = vst [vmem:[#allocation2 + $0x58] sm:$0xff] %v1438_v3   ;;  %v747_v15 = vadd.f32 %v1901_v39, %v676_v5  ;;  %v677_v17 = vmul.f32 %v1633_v13, %v1896_v37  ;;  %v487_v19 = vpop.f32.mrb[27].mxu0  ;;  %v615_v20 = vpop.f32.mrb[27].mxu1 }
 0x110   :  { %1566 = vst [vmem:[#allocation2 + $0xd8] sm:$0xff] %v1518_v4   ;;  %v779_v16 = vadd.f32 %v1901_v39, %v708_v6  ;;  %v709_v18 = vmul.f32 %v1665_v14, %v1896_v37  ;;  %v745_v21 = vadd.f32 %v1901_v39, %v674_v11  ;;  %v777_v22 = vadd.f32 %v1901_v39, %v706_v12 }
 0x111   :  { %1549 = vst [vmem:[#allocation2 + $0x50] sm:$0xff] %v1433_v9   ;;  %1565 = vst [vmem:[#allocation2 + $0xd0] sm:$0xff] %v1513_v10   ;;  %v675_v23 = vmul.f32 %v1896_v37, %v487_v19  ;;  %v707_v24 = vmul.f32 %v1896_v37, %v615_v20  ;;  %v748_v25 = vadd.f32 %v1901_v39, %v677_v17  ;;  %v811_v29 = vmax.f32 %v747_v15, 0.0 }
 0x112   :  { %v780_v26 = vadd.f32 %v1901_v39, %v709_v18  ;;  %v843_v30 = vmax.f32 %v779_v16, 0.0  ;;  %v809_v33 = vmax.f32 %v745_v21, 0.0  ;;  %v841_v34 = vmax.f32 %v777_v22, 0.0 }
 0x113   :  { %v746_v27 = vadd.f32 %v1901_v39, %v675_v23  ;;  %v778_v28 = vadd.f32 %v1901_v39, %v707_v24  ;;  %v812_v31 = vmax.f32 %v748_v25, 0.0 }
 0x114   :  { %v844_v32 = vmax.f32 %v780_v26, 0.0  ;;  %v1636_v38 = vpop.f32.mrb[28].mxu0  ;;  %v1668_v40 = vpop.f32.mrb[28].mxu1 }
 0x115   :  { %v810_v35 = vmax.f32 %v746_v27, 0.0  ;;  %v842_v36 = vmax.f32 %v778_v28, 0.0  ;;  %v1448_v41 = vpack.c.bf16 %v812_v31, %v811_v29  ;;  %v680_v43 = vmul.f32 %v1636_v38, %v1896_v37  ;;  %v500_v45 = vpop.f32.mrb[29].mxu0  ;;  %v628_v46 = vpop.f32.mrb[29].mxu1 }
 0x116   :  { %v1528_v42 = vpack.c.bf16 %v844_v32, %v843_v30  ;;  %v712_v44 = vmul.f32 %v1668_v40, %v1896_v37  ;;  %v678_v49 = vmul.f32 %v1896_v37, %v500_v45  ;;  %v710_v50 = vmul.f32 %v1896_v37, %v628_v46  ;;  %v1637_v51 = vpop.f32.mrb[30].mxu0  ;;  %v1669_v52 = vpop.f32.mrb[30].mxu1 }
 0x117   :  { %v1443_v47 = vpack.c.bf16 %v810_v35, %v809_v33  ;;  %v1523_v48 = vpack.c.bf16 %v842_v36, %v841_v34  ;;  %1552 = vst [vmem:[#allocation2 + $0x68] sm:$0xff] %v1448_v41   ;;  %v751_v53 = vadd.f32 %v1901_v39, %v680_v43  ;;  %v681_v55 = vmul.f32 %v1637_v51, %v1896_v37  ;;  %v503_v57 = vpop.f32.mrb[31].mxu0  ;;  %v631_v58 = vpop.f32.mrb[31].mxu1 }
 0x118   :  { %1568 = vst [vmem:[#allocation2 + $0xe8] sm:$0xff] %v1528_v42   ;;  %v783_v54 = vadd.f32 %v1901_v39, %v712_v44  ;;  %v713_v56 = vmul.f32 %v1669_v52, %v1896_v37  ;;  %v749_v59 = vadd.f32 %v1901_v39, %v678_v49  ;;  %v781_v60 = vadd.f32 %v1901_v39, %v710_v50 }
 0x119   :  { %1551 = vst [vmem:[#allocation2 + $0x60] sm:$0xff] %v1443_v47   ;;  %1567 = vst [vmem:[#allocation2 + $0xe0] sm:$0xff] %v1523_v48   ;;  %v679_v61 = vmul.f32 %v1896_v37, %v503_v57  ;;  %v711_v62 = vmul.f32 %v1896_v37, %v631_v58  ;;  %v752_v63 = vadd.f32 %v1901_v39, %v681_v55  ;;  %v815_v3 = vmax.f32 %v751_v53, 0.0 }
 0x11a   :  { %v784_v0 = vadd.f32 %v1901_v39, %v713_v56  ;;  %v847_v4 = vmax.f32 %v783_v54, 0.0  ;;  %v813_v7 = vmax.f32 %v749_v59, 0.0  ;;  %v845_v8 = vmax.f32 %v781_v60, 0.0 }
 0x11b   :  { %v750_v1 = vadd.f32 %v1901_v39, %v679_v61  ;;  %v782_v2 = vadd.f32 %v1901_v39, %v711_v62  ;;  %v816_v5 = vmax.f32 %v752_v63, 0.0 }
 0x11c   :  { %v848_v6 = vmax.f32 %v784_v0, 0.0 }
 0x11d   :  { %v814_v9 = vmax.f32 %v750_v1, 0.0  ;;  %v846_v10 = vmax.f32 %v782_v2, 0.0  ;;  %v1458_v11 = vpack.c.bf16 %v816_v5, %v815_v3 }
 0x11e   :  { %v1538_v37 = vpack.c.bf16 %v848_v6, %v847_v4 }
 0x11f   :  { %v1453_v12 = vpack.c.bf16 %v814_v9, %v813_v7  ;;  %v1533_v13 = vpack.c.bf16 %v846_v10, %v845_v8  ;;  %1554 = vst [vmem:[#allocation2 + $0x78] sm:$0xff] %v1458_v11  }
 0x120   :  { %1570 = vst [vmem:[#allocation2 + $0xf8] sm:$0xff] %v1538_v37  }
 0x121   :  { %1553 = vst [vmem:[#allocation2 + $0x70] sm:$0xff] %v1453_v12   ;;  %1569 = vst [vmem:[#allocation2 + $0xf0] sm:$0xff] %v1533_v13  }
 0x122   :  { %1720 = shalt.err (!%p1717_p4)
}
 0x123   :  { %s1721_s6 = scalar_lea.hbm %s2047_s4, 4096 }
 0x124   :  { %p1722_p5 = scmp.ne.s32.totalorder %s2047_s4, %s1721_s6  ;;  %p1725_p6 = scmp.lt.u32.totalorder %s1721_s6, %s2047_s4 }
 0x126   :  { %p1727_p7 = pnand %p1725_p6, %p1722_p5 }
 0x128   :  { %1730 = shalt.err (!%p1727_p7)
}
 0x129   :  { %s1735_s11 = smov 64   ;;  %s1736_s12 = smov 4  }
 0x12a   :  { %1180 = dma.vmem_to_hbm [thread:$0]  %s1175_s2, 4096, %s2047_s4, [#allocation3], %s1735_s11, %s1735_s11, %s1736_s12  }
 0x12b   :  { %1731 = dma.done.wait [#allocation3], 4096  }
 0x12c   :  { %1732 = vsyncadd [#allocation3], 4294963200 }
 0x12d   :  { %1184 = vsyncpa [#allocation3], 1 }

</bundles_post_ra>
